<compile_context>
chip_gen: v5e
topology: v5e:2x2
jax: 0.10.0
libtpu: 0.0.40
codegen_flags: <defaults>
</compile_context>

<pallas_src>
import functools

import jax
import jax.numpy as jnp
from jax import lax
from jax.experimental import pallas as pl
from jax.experimental.pallas import tpu as pltpu


def adagn_kernel(x_ref, a_ref, b_ref, o_ref, *, eps, chunk, n_chunks, unroll):
    # x_ref block: (1, Gb, Cg, HW) where Gb is `groups` (whole-sample mode) or 1.
    Gb = x_ref.shape[1]
    Cg = x_ref.shape[2]
    HW = x_ref.shape[3]
    inv_count = 1.0 / float(Cg * HW)

    def chunk_slice(j):
        start = pl.multiple_of(j * chunk, chunk)
        return pl.ds(start, chunk)

    # ---- Pass 1: fused per-group sum / sum-of-squares (chunked over HW). ----
    # Accumulate lane-wise (Gb, 1, chunk) so the expensive cross-lane reduce is
    # done exactly once after the loop; per-chunk reduce is only over sublanes.
    zeros = jnp.zeros((Gb, 1, chunk), jnp.float32)

    def stats_body(j, carry):
        s_acc, sq_acc = carry
        xi = x_ref[0, :, :, chunk_slice(j)].astype(jnp.float32)  # (Gb, Cg, chunk)
        s_acc = s_acc + jnp.sum(xi, axis=1, keepdims=True)
        sq_acc = sq_acc + jnp.sum(xi * xi, axis=1, keepdims=True)
        return s_acc, sq_acc

    s_acc, sq_acc = lax.fori_loop(0, n_chunks, stats_body, (zeros, zeros),
                                  unroll=unroll)
    mean = jnp.sum(s_acc, axis=2, keepdims=True) * inv_count     # (Gb, 1, 1)
    ex2 = jnp.sum(sq_acc, axis=2, keepdims=True) * inv_count
    var = jnp.maximum(ex2 - mean * mean, 0.0)

    # ---- Fold GroupNorm affine + style modulation into scale/shift. ----
    rstd = lax.rsqrt(var + eps)                                  # (Gb, 1, 1)
    a = a_ref[0].astype(jnp.float32)                             # (Gb, Cg, 1) = gn_w * factor
    b = b_ref[0].astype(jnp.float32)                             # (Gb, Cg, 1) = bias + gn_b * factor
    scale = rstd * a                                             # (Gb, Cg, 1)
    shift = b - mean * scale                                     # (Gb, Cg, 1)
    # Hoist the lane broadcasts out of the apply loop.
    scale_b = jnp.broadcast_to(scale, (Gb, Cg, chunk))
    shift_b = jnp.broadcast_to(shift, (Gb, Cg, chunk))

    # ---- Pass 2: o = x * scale + shift, chunkwise lane-dense stores. ----
    def apply_body(j, carry):
        sl = chunk_slice(j)
        xi = x_ref[0, :, :, sl].astype(jnp.float32)
        o_ref[0, :, :, sl] = (xi * scale_b + shift_b).astype(o_ref.dtype)
        return carry

    lax.fori_loop(0, n_chunks, apply_body, 0, unroll=unroll)


def _pick_chunk(hw):
    """Largest HW sub-tile <= 512 that divides HW and keeps 128-lane alignment."""
    for c in (512, 384, 256, 128):
        if hw % c == 0:
            return c
    return hw  # fall back to a single chunk for odd spatial sizes


def adagn_forward(image, style, emd_w, emd_b, gn_w, gn_b, *, groups, eps=1e-5):
    """image: (N, C, H, W); style: (N, S, 1, 1); emd_w: (2C, S, 1, 1); emd_b: (2C,)."""
    N, C, H, W = image.shape
    S = style.shape[1]
    HW = H * W
    Cg = C // groups

    # Hoisted style 1x1 conv (tiny matmul, terrible MXU shape inside a kernel).
    style_vec = style.reshape(N, S).astype(jnp.float32)
    w2 = emd_w.reshape(2 * C, S).astype(jnp.float32)
    emb = style_vec @ w2.T + emd_b[None, :].astype(jnp.float32)          # (N, 2C)
    factor, bias = emb[:, :C], emb[:, C:]
    # Fold GroupNorm affine into the modulation:  y = xn * A + B
    A = (gn_w[None, :].astype(jnp.float32) * factor).reshape(N, groups, Cg, 1)
    B = (bias + gn_b[None, :].astype(jnp.float32) * factor).reshape(N, groups, Cg, 1)

    # Group-major layout (free, contiguous reshape); spatial on the lane axis.
    x = image.reshape(N, groups, Cg, HW)

    chunk = _pick_chunk(HW)
    n_chunks = HW // chunk
    unroll = n_chunks if n_chunks <= 8 else 8   # bound code bloat at big HW

    itemsize = jnp.dtype(image.dtype).itemsize
    sample_bytes = C * HW * itemsize

    # Prefer one whole sample per grid step; fall back to one group per step if
    # the per-sample block would blow past a comfortable VMEM budget (v7x has
    # only 64 MiB of VMEM per TensorCore).
    if sample_bytes <= (8 << 20):
        grid = (N,)
        g_block = groups
        idx = lambda n: (n, 0, 0, 0)
        dims = ("parallel",)
        block_bytes = sample_bytes
    else:
        grid = (N, groups)
        g_block = 1
        idx = lambda n, g: (n, g, 0, 0)
        dims = ("parallel", "parallel")
        block_bytes = Cg * HW * itemsize

    # 2x(in) + 2x(out) double-buffered, plus headroom; stay under v7x's VMEM.
    vmem_limit = int(min(max(4 * block_bytes + (4 << 20), 16 << 20), 48 << 20))

    x_spec = pl.BlockSpec((1, g_block, Cg, HW), idx)
    ab_spec = pl.BlockSpec((1, g_block, Cg, 1), idx)

    out = pl.pallas_call(
        functools.partial(adagn_kernel, eps=eps, chunk=chunk,
                          n_chunks=n_chunks, unroll=unroll),
        out_shape=jax.ShapeDtypeStruct((N, groups, Cg, HW), image.dtype),
        grid_spec=pltpu.PrefetchScalarGridSpec(
            num_scalar_prefetch=0,
            grid=grid,
            in_specs=[x_spec, ab_spec, ab_spec],
            out_specs=x_spec,
        ),
        compiler_params=pltpu.CompilerParams(
            dimension_semantics=dims,
            vmem_limit_bytes=vmem_limit),
    )(x, A, B)
    return out.reshape(N, C, H, W)


def adagn_reference(image, style, emd_w, emd_b, gn_w, gn_b, *, groups, eps=1e-5):
    """Pure-JAX reference mirroring the PyTorch module."""
    N, C, H, W = image.shape
    w2 = emd_w.reshape(2 * C, -1)
    emb = jnp.einsum('os,nshw->nohw', w2, style) + emd_b[None, :, None, None]
    factor, bias = emb[:, :C], emb[:, C:]
    xr = image.reshape(N, groups, C // groups, H, W)
    mean = xr.mean(axis=(2, 3, 4), keepdims=True)
    var = jnp.square(xr - mean).mean(axis=(2, 3, 4), keepdims=True)
    xn = ((xr - mean) / jnp.sqrt(var + eps)).reshape(N, C, H, W)
    y = xn * gn_w[None, :, None, None] + gn_b[None, :, None, None]
    return y * factor + bias


if __name__ == "__main__":
    N, C, G, S, H, W = 2, 16, 2, 8, 16, 16

    key = jax.random.PRNGKey(0)
    k_img, k_sty, k_w = jax.random.split(key, 3)
    image = jax.random.normal(k_img, (N, C, H, W), jnp.float32)
    style = jax.random.normal(k_sty, (N, S, 1, 1), jnp.float32)

    # Conv2d(style_dim, 2*C, 1) params; bias init as in the module's __init__
    # (first C entries 1, last C entries 0).
    bound = 1.0 / (S ** 0.5)
    emd_w = jax.random.uniform(k_w, (2 * C, S, 1, 1), jnp.float32, -bound, bound)
    emd_b = jnp.concatenate([jnp.ones((C,), jnp.float32),
                             jnp.zeros((C,), jnp.float32)])
    # GroupNorm affine params (PyTorch default init: weight=1, bias=0)
    gn_w = jnp.ones((C,), jnp.float32)
    gn_b = jnp.zeros((C,), jnp.float32)

    out = adagn_forward(image, style, emd_w, emd_b, gn_w, gn_b, groups=G)
    out = jax.block_until_ready(out)

    ref = adagn_reference(image, style, emd_w, emd_b, gn_w, gn_b, groups=G)
    assert out.shape == (N, C, H, W)
    assert jnp.allclose(out, ref, atol=1e-4, rtol=1e-4), "mismatch vs reference"
    print("KERNEL_OK")
</pallas_src>

<mosaic_0001>
module attributes {stable_mosaic.version = 11 : i64} {
  func.func @adagn_kernel(%arg0: i32, %arg1: memref<1x2x8x256xf32, #tpu.memory_space<vmem>>, %arg2: memref<1x2x8x1xf32, #tpu.memory_space<vmem>>, %arg3: memref<1x2x8x1xf32, #tpu.memory_space<vmem>>, %arg4: memref<1x2x8x256xf32, #tpu.memory_space<vmem>>) attributes {dimension_semantics = [#tpu.dimension_semantics<parallel>], iteration_bounds = array<i64: 2>, scalar_prefetch = 0 : i64, scratch_operands = 0 : i64, tpu.core_type = #tpu.core_type<tc>, window_params = [{transform_indices = @transform_0, window_bounds = array<i64: 1, 2, 8, 256>}, {transform_indices = @transform_1, window_bounds = array<i64: 1, 2, 8, 1>}, {transform_indices = @transform_2, window_bounds = array<i64: 1, 2, 8, 1>}, {transform_indices = @transform_3, window_bounds = array<i64: 1, 2, 8, 256>}]} {
    %cst = arith.constant 0.000000e+00 : f32
    %0 = vector.broadcast %cst : f32 to vector<2x1x256xf32>
    %c0_i32 = arith.constant 0 : i32
    %c256_i32 = arith.constant 256 : i32
    %1 = arith.muli %c0_i32, %c256_i32 : i32
    %2 = tpu.assume_multiple %1, 256 : i32
    %c0 = arith.constant 0 : index
    %c0_0 = arith.constant 0 : index
    %c0_1 = arith.constant 0 : index
    %3 = arith.index_cast %2 : i32 to index
    %4 = vector.load %arg1[%c0, %c0_0, %c0_1, %3] : memref<1x2x8x256xf32, #tpu.memory_space<vmem>>, vector<1x2x8x256xf32>
    %5 = vector.shape_cast %4 : vector<1x2x8x256xf32> to vector<2x8x256xf32>
    %cst_2 = arith.constant dense<0.000000e+00> : vector<2x256xf32>
    %6 = vector.multi_reduction <add>, %5, %cst_2 [1] : vector<2x8x256xf32> to vector<2x256xf32>
    %7 = vector.shape_cast %6 : vector<2x256xf32> to vector<2x1x256xf32>
    %8 = arith.addf %0, %7 : vector<2x1x256xf32>
    %9 = arith.mulf %5, %5 : vector<2x8x256xf32>
    %cst_3 = arith.constant dense<0.000000e+00> : vector<2x256xf32>
    %10 = vector.multi_reduction <add>, %9, %cst_3 [1] : vector<2x8x256xf32> to vector<2x256xf32>
    %11 = vector.shape_cast %10 : vector<2x256xf32> to vector<2x1x256xf32>
    %12 = arith.addf %0, %11 : vector<2x1x256xf32>
    %c1_i32 = arith.constant 1 : i32
    %cst_4 = arith.constant dense<0.000000e+00> : vector<2x1xf32>
    %13 = vector.multi_reduction <add>, %8, %cst_4 [2] : vector<2x1x256xf32> to vector<2x1xf32>
    %14 = vector.shape_cast %13 : vector<2x1xf32> to vector<2x1x1xf32>
    %cst_5 = arith.constant 4.8828125E-4 : f32
    %15 = vector.broadcast %cst_5 : f32 to vector<2x1x1xf32>
    %16 = arith.mulf %14, %15 : vector<2x1x1xf32>
    %cst_6 = arith.constant dense<0.000000e+00> : vector<2x1xf32>
    %17 = vector.multi_reduction <add>, %12, %cst_6 [2] : vector<2x1x256xf32> to vector<2x1xf32>
    %18 = vector.shape_cast %17 : vector<2x1xf32> to vector<2x1x1xf32>
    %cst_7 = arith.constant 4.8828125E-4 : f32
    %19 = vector.broadcast %cst_7 : f32 to vector<2x1x1xf32>
    %20 = arith.mulf %18, %19 : vector<2x1x1xf32>
    %21 = arith.mulf %16, %16 : vector<2x1x1xf32>
    %22 = arith.subf %20, %21 : vector<2x1x1xf32>
    %cst_8 = arith.constant 0.000000e+00 : f32
    %23 = vector.broadcast %cst_8 : f32 to vector<2x1x1xf32>
    %24 = arith.maximumf %22, %23 : vector<2x1x1xf32>
    %cst_9 = arith.constant 9.99999974E-6 : f32
    %25 = vector.broadcast %cst_9 : f32 to vector<2x1x1xf32>
    %26 = arith.addf %24, %25 : vector<2x1x1xf32>
    %27 = math.rsqrt %26 : vector<2x1x1xf32>
    %c0_10 = arith.constant 0 : index
    %c0_11 = arith.constant 0 : index
    %c0_12 = arith.constant 0 : index
    %c0_13 = arith.constant 0 : index
    %28 = vector.load %arg2[%c0_10, %c0_11, %c0_12, %c0_13] : memref<1x2x8x1xf32, #tpu.memory_space<vmem>>, vector<1x2x8x1xf32>
    %29 = vector.shape_cast %28 : vector<1x2x8x1xf32> to vector<2x8x1xf32>
    %c0_14 = arith.constant 0 : index
    %c0_15 = arith.constant 0 : index
    %c0_16 = arith.constant 0 : index
    %c0_17 = arith.constant 0 : index
    %30 = vector.load %arg3[%c0_14, %c0_15, %c0_16, %c0_17] : memref<1x2x8x1xf32, #tpu.memory_space<vmem>>, vector<1x2x8x1xf32>
    %31 = vector.shape_cast %30 : vector<1x2x8x1xf32> to vector<2x8x1xf32>
    %32 = vector.broadcast %27 : vector<2x1x1xf32> to vector<2x8x1xf32>
    %33 = arith.mulf %32, %29 : vector<2x8x1xf32>
    %34 = vector.broadcast %16 : vector<2x1x1xf32> to vector<2x8x1xf32>
    %35 = arith.mulf %34, %33 : vector<2x8x1xf32>
    %36 = arith.subf %31, %35 : vector<2x8x1xf32>
    %37 = vector.shape_cast %33 : vector<2x8x1xf32> to vector<2x8x1xf32>
    %38 = vector.broadcast %37 : vector<2x8x1xf32> to vector<2x8x256xf32>
    %39 = vector.shape_cast %36 : vector<2x8x1xf32> to vector<2x8x1xf32>
    %40 = vector.broadcast %39 : vector<2x8x1xf32> to vector<2x8x256xf32>
    %c0_i32_18 = arith.constant 0 : i32
    %c256_i32_19 = arith.constant 256 : i32
    %41 = arith.muli %c0_i32_18, %c256_i32_19 : i32
    %42 = tpu.assume_multiple %41, 256 : i32
    %c0_20 = arith.constant 0 : index
    %c0_21 = arith.constant 0 : index
    %c0_22 = arith.constant 0 : index
    %43 = arith.index_cast %42 : i32 to index
    %44 = vector.load %arg1[%c0_20, %c0_21, %c0_22, %43] : memref<1x2x8x256xf32, #tpu.memory_space<vmem>>, vector<1x2x8x256xf32>
    %45 = vector.shape_cast %44 : vector<1x2x8x256xf32> to vector<2x8x256xf32>
    %46 = arith.mulf %45, %38 : vector<2x8x256xf32>
    %47 = arith.addf %46, %40 : vector<2x8x256xf32>
    %c0_23 = arith.constant 0 : index
    %c0_24 = arith.constant 0 : index
    %c0_25 = arith.constant 0 : index
    %48 = arith.index_cast %42 : i32 to index
    %49 = vector.load %arg4[%c0_23, %c0_24, %c0_25, %48] : memref<1x2x8x256xf32, #tpu.memory_space<vmem>>, vector<1x2x8x256xf32>
    %50 = vector.shape_cast %49 : vector<1x2x8x256xf32> to vector<2x8x256xf32>
    %51 = vector.shape_cast %47 : vector<2x8x256xf32> to vector<1x2x8x256xf32>
    tpu.vector_store %arg4[%c0_23, %c0_24, %c0_25, %48], %51 {strides = array<i32>} : memref<1x2x8x256xf32, #tpu.memory_space<vmem>>, vector<1x2x8x256xf32>,
    %c1_i32_26 = arith.constant 1 : i32
    return
  }
  func.func @transform_0(%arg0: i32) -> (i32, i32, i32, i32) {
    %c0_i32 = arith.constant 0 : i32
    %c0_i32_0 = arith.constant 0 : i32
    %c0_i32_1 = arith.constant 0 : i32
    %c0_i32_2 = arith.constant 0 : i32
    return %arg0, %c0_i32, %c0_i32_0, %c0_i32_1 : i32, i32, i32, i32
  }
  func.func @transform_1(%arg0: i32) -> (i32, i32, i32, i32) {
    %c0_i32 = arith.constant 0 : i32
    %c0_i32_0 = arith.constant 0 : i32
    %c0_i32_1 = arith.constant 0 : i32
    %c0_i32_2 = arith.constant 0 : i32
    return %arg0, %c0_i32, %c0_i32_0, %c0_i32_1 : i32, i32, i32, i32
  }
  func.func @transform_2(%arg0: i32) -> (i32, i32, i32, i32) {
    %c0_i32 = arith.constant 0 : i32
    %c0_i32_0 = arith.constant 0 : i32
    %c0_i32_1 = arith.constant 0 : i32
    %c0_i32_2 = arith.constant 0 : i32
    return %arg0, %c0_i32, %c0_i32_0, %c0_i32_1 : i32, i32, i32, i32
  }
  func.func @transform_3(%arg0: i32) -> (i32, i32, i32, i32) {
    %c0_i32 = arith.constant 0 : i32
    %c0_i32_0 = arith.constant 0 : i32
    %c0_i32_1 = arith.constant 0 : i32
    %c0_i32_2 = arith.constant 0 : i32
    return %arg0, %c0_i32, %c0_i32_0, %c0_i32_1 : i32, i32, i32, i32
  }
}

</mosaic_0001>

<bundles_post_ra>
// kernel: tpu_custom_call.1
= control target key start
LH: loop header
LB: loop body
LE: loop exit
PB: predicated region body
PF: predicated region fallthrough
CT: control target
= control target key end

     0   :  { %8 = vsyncpa [#allocation3], 0  ;;  %s740_s0 = inlined_call_operand.vmem [shape: f32[2,2,8,256], index: 0, kind: input, shape index: {}]   ;;  %s741_s1 = inlined_call_operand.vmem [shape: f32[2,2,8,1], index: 1, kind: input, shape index: {}]   ;;  %s742_s2 = inlined_call_operand.vmem [shape: f32[2,2,8,1], index: 2, kind: input, shape index: {}]   ;;  %s743_s3 = inlined_call_operand.hbm [shape: f32[2,2,8,256], index: 3, kind: output, shape index: {}]  }
   0x1   :  { %10 = vsyncpa [#allocation3 + $0x1], 0  ;;  %s617_s12 = smov 0   ;;  %s619_s13 = smov 0  }
   0x2   :  { %s621_s14 = smov 0   ;;  %s623_s15 = smov 0  }
   0x3 LB: > { %s638_s16 = sadd.s32 4294967295, %s592_s15   ;;  %s461_s17 = sadd.s32 4294967294, %s592_s15   ;;  %s592_s15 = sphi %s623_s15, %s749_s15   ;;  %s588_s14 = sphi %s621_s14, %s748_s14   ;;  %s584_s13 = sphi %s619_s13, %s747_s13   ;;  %s580_s12 = sphi %s617_s12, %s746_s12  }
   0x4   : > { %s642_s18 = sadd.s32 1, %s592_s15   ;;  %s101_s19 = sadd.s32 1, %s588_s14 }
   0x5   : > { %s98_s20 = ssub.s32 %s592_s15, %s642_s18  ;;  %p111_p0 = scmp.ne.s32.totalorder %s588_s14, %s584_s13 }
   0x6   : > { %p99_p1 = scmp.eq.s32.totalorder %s98_s20, 0  ;;  %p112_p2 = scmp.eq.s32.totalorder %s638_s16, 1 }
   0x7   : > { %p117_p3 = scmp.ne.s32.totalorder %s584_s13, %s580_s12  ;;  %p118_p4 = scmp.eq.s32.totalorder %s461_s17, 1 }
   0x8   : > { %s653_s21 = scalar_select %p99_p1, %s588_s14, %s101_s19  }
   0x9   : > { %p655_p5 = por %p112_p2, %p111_p0  ;;  %p659_p6 = por %p118_p4, %p117_p3 }
   0xa   : > { %p464_p7 = scmp.ge.s32.totalorder %s592_s15, 1  ;;  %p160_p8 = scmp.lt.s32.totalorder %s592_s15, 3 }
   0xc   : > { %p161_p9 = pnand %p464_p7, %p160_p8 }
   0xd   : > { %p194_p10 = scmp.lt.s32.totalorder (!%p161_p9), %s638_s16, 1  ;;  %s191_s9 = sand.u32 (!%p161_p9), 1, %s584_s13  }
   0xe   : > { %164 = sbr.rel (%p161_p9) target bundleno = 318 (0x13e), region = 32  ;;  %s465_s10 = sshll.u32 (!%p161_p9), %s191_s9, 5 }
   0xf   : > { %s480_s11 = sshll.u32 (!%p161_p9), %s638_s16, 5  ;;  %s193_s17 = scalar_lea.vmem (!%p161_p9), [#allocation2], %s465_s10 }
  0x10   : > { %s550_s4 = scalar_lea.hbm (!%p161_p9), %s743_s3, 64 }
  0x13   : > { %s667_s24 = scalar_select %p194_p10, %s638_s16, 1  ;;  %v594_v60 = vmov 0  }
  0x14   : > { %523 = vset.pattern.permute.xlu2 %v594_v60  ;;  %524 = vset.pattern.permute.xlu0 %v594_v60  ;;  %s360_s16 = scalar_lea.sflag [#allocation3], %s191_s9 }
  0x15   : > { %s477_s25 = sshll.u32 %s667_s24, 5  ;;  %525 = vset.pattern.permute.xlu1 %v594_v60  ;;  %s478_s29 = sshll.u32 %s667_s24, 4 }
  0x16   : > { %s198_s28 = scalar_lea.vmem %s740_s0, %s477_s25  ;;  %s203_s5 = scalar_lea.vmem %s741_s1, %s478_s29 }
  0x17   : > { %v673_v0 = vld [vmem:[%s198_s28] sm:$0xff]  ;;  %v675_v1 = vld [vmem:[%s198_s28 + $0x8] sm:$0xff]  ;;  %v677_v2 = vld [vmem:[%s198_s28 + $0x10] sm:$0xff]  ;;  %s208_s8 = scalar_lea.vmem %s742_s2, %s478_s29  ;;  %s371_s24 = scalar_lea.hbm %s743_s3, %s480_s11 }
  0x18   : > { %v213_v3 = vrot.slane %v673_v0, 4  ;;  %v219_v4 = vrot.slane %v675_v1, 4  ;;  %v241_v5 = vmul.f32 %v673_v0, %v673_v0  ;;  %v242_v6 = vmul.f32 %v675_v1, %v675_v1  ;;  %v685_v7 = vld [vmem:[%s198_s28 + $0x18] sm:$0xff]  ;;  %s372_s25 = sshll.u32 %s193_s17, 4  ;;  %s374_s26 = sshll.u32 %s371_s24, 4  ;;  %s373_s25 = int_to_ptr.vmem [resolvable:$true] %s372_s25  ;;  %s375_s26 = int_to_ptr.hbm [resolvable:$true] %s374_s26 }
  0x19   : > { %v225_v8 = vrot.slane %v677_v2, 4  ;;  %v231_v9 = vrot.slane %v685_v7, 4  ;;  %v243_v10 = vmul.f32 %v677_v2, %v677_v2  ;;  %v244_v11 = vmul.f32 %v685_v7, %v685_v7  ;;  %s544_s27 = sshra.s32 %s375_s26, 4  ;;  %s545_s27 = int_to_ptr.hbm [resolvable:$true] %s544_s27 }
  0x1a   : > { %v214_v12 = vadd.f32 %v213_v3, %v673_v0  ;;  %v220_v13 = vadd.f32 %v219_v4, %v675_v1  ;;  %v245_v14 = vrot.slane %v241_v5, 4  ;;  %v251_v15 = vrot.slane %v242_v6, 4  ;;  %s546_s28 = scalar_lea.hbm %s545_s27, 32  ;;  %p551_p0 = scmp.lt.s32.totalorder %s545_s27, %s743_s3 }
  0x1b   : > { %v226_v16 = vadd.f32 %v225_v8, %v677_v2  ;;  %v232_v17 = vadd.f32 %v231_v9, %v685_v7  ;;  %v257_v18 = vrot.slane %v243_v10, 4  ;;  %v263_v19 = vrot.slane %v244_v11, 4  ;;  %p547_p11 = scmp.ne.s32.totalorder %s545_s27, %s546_s28  ;;  %p552_p1 = scmp.lt.s32.totalorder %s550_s4, %s546_s28 }
  0x1c   : > { %v215_v20 = vrot.slane %v214_v12, 2  ;;  %v221_v21 = vrot.slane %v220_v13, 2  ;;  %v246_v22 = vadd.f32 %v245_v14, %v241_v5  ;;  %v252_v23 = vadd.f32 %v251_v15, %v242_v6 }
  0x1d   : > { %v227_v24 = vrot.slane %v226_v16, 2  ;;  %v233_v25 = vrot.slane %v232_v17, 2  ;;  %v258_v26 = vadd.f32 %v257_v18, %v243_v10  ;;  %v264_v27 = vadd.f32 %v263_v19, %v244_v11  ;;  %p548_p12 = pnand %p547_p11, %p655_p5  ;;  %p553_p2 = por %p552_p1, %p551_p0 }
  0x1e   : > { %v216_v28 = vadd.f32 %v215_v20, %v214_v12  ;;  %v222_v29 = vadd.f32 %v221_v21, %v220_v13  ;;  %v247_v30 = vrot.slane %v246_v22, 2  ;;  %v253_v31 = vrot.slane %v252_v23, 2 }
  0x1f   : > { %v228_v32 = vadd.f32 %v227_v24, %v226_v16  ;;  %v234_v33 = vadd.f32 %v233_v25, %v232_v17  ;;  %v259_v34 = vrot.slane %v258_v26, 2  ;;  %v265_v35 = vrot.slane %v264_v27, 2  ;;  %v317_v25 = vld [vmem:[%s203_s5] sm:$0xff]  ;;  %p549_p13 = pneg %p548_p12 }
  0x20   : > { %v217_v36 = vrot.slane %v216_v28, 1  ;;  %v223_v37 = vrot.slane %v222_v29, 1  ;;  %v248_v38 = vadd.f32 %v247_v30, %v246_v22  ;;  %v254_v39 = vadd.f32 %v253_v31, %v252_v23  ;;  %v319_v30 = vld [vmem:[%s208_s8] sm:$0xff] }
  0x21   : > { %v229_v40 = vrot.slane %v228_v32, 1  ;;  %v235_v41 = vrot.slane %v234_v33, 1  ;;  %v260_v42 = vadd.f32 %v259_v34, %v258_v26  ;;  %v266_v43 = vadd.f32 %v265_v35, %v264_v27  ;;  %v318_v34 = vld [vmem:[%s203_s5 + $0x8] sm:$0xff]  ;;  %p554_p3 = pnand %p553_p2, %p549_p13 }
  0x22   : > { %v218_v44 = vadd.f32 %v217_v36, %v216_v28  ;;  %v224_v45 = vadd.f32 %v223_v37, %v222_v29  ;;  %v249_v46 = vrot.slane %v248_v38, 1  ;;  %v255_v47 = vrot.slane %v254_v39, 1 }
  0x23   : > { %v261_v48 = vrot.slane %v260_v42, 1  ;;  %v267_v52 = vrot.slane %v266_v43, 1  ;;  %v230_v54 = vadd.f32 %v229_v40, %v228_v32  ;;  %v236_v55 = vadd.f32 %v235_v41, %v234_v33 }
  0x24   : > { %v273_v49 = vadd.f32 %v224_v45, %v218_v44  ;;  %v250_v50 = vadd.f32 %v249_v46, %v248_v38  ;;  %v256_v51 = vadd.f32 %v255_v47, %v254_v39  ;;  %v320_v38 = vld [vmem:[%s208_s8 + $0x8] sm:$0xff] }
  0x25   : > { %v262_v56 = vadd.f32 %v261_v48, %v260_v42  ;;  %v268_v57 = vadd.f32 %v267_v52, %v266_v43  ;;  %v276_v58 = vadd.f32 %v236_v55, %v230_v54 }
  0x26   : > { %274 = vadd.xlane.f32.xlu0 %v273_v49  ;;  %v281_v53 = vadd.f32 %v256_v51, %v250_v50 }
  0x27   : > { %v284_v59 = vadd.f32 %v268_v57, %v262_v56 }
  0x28   : > { %282 = vadd.xlane.f32.xlu1 %v281_v53 }
  0x2e   : > { %277 = vadd.xlane.f32.xlu0 %v276_v58 }
  0x30   : > { %285 = vadd.xlane.f32.xlu1 %v284_v59 }
  0x99   : > { %v275_v61 = vpop.xlane.xlu0 %274 }
  0x9a   : > { %v279_v62 = vmul.f32 0.00048828125, %v275_v61 }
  0x9b   : > { %v283_v63 = vpop.xlane.xlu1 %282 }
  0x9c   : > { %v289_v3 = vmul.f32 %v279_v62, %v279_v62  ;;  %v287_v4 = vmul.f32 0.00048828125, %v283_v63 }
  0x9e   : > { %v291_v5 = vsub.f32 %v287_v4, %v289_v3 }
  0xa0   : > { %v293_v6 = vmax.f32 %v291_v5, 0.0 }
  0xa1   : > { %v278_v8 = vpop.xlane.xlu0 %277 }
  0xa2   : > { %v295_v9 = vadd.f32 1e-05, %v293_v6  ;;  %v280_v10 = vmul.f32 0.00048828125, %v278_v8 }
  0xa3   : > { %v286_v11 = vpop.xlane.xlu1 %285 }
  0xa4   : > { %526 = vrsqrt.f32 %v295_v9  ;;  %v290_v12 = vmul.f32 %v280_v10, %v280_v10  ;;  %v288_v13 = vmul.f32 0.00048828125, %v286_v11  ;;  %vm303_vm1 = vweird.f32 %v295_v9 }
  0xa6   : > { %v292_v14 = vsub.f32 %v288_v13, %v290_v12 }
  0xa8   : > { %v294_v15 = vmax.f32 %v292_v14, 0.0 }
  0xaa   : > { %v527_v16 = vpop.eup %526  ;;  %v296_v17 = vadd.f32 1e-05, %v294_v15 }
  0xab   : > { %v298_v18 = vmul.f32 %v527_v16, %v295_v9  ;;  %vm304_vm0 = vweird.f32 %v527_v16 }
  0xac   : > { %528 = vrsqrt.f32 %v296_v17  ;;  %vm305_vm2 = vmor %vm303_vm1, %vm304_vm0  ;;  %vm313_vm4 = vweird.f32 %v296_v17 }
  0xad   : > { %v299_v19 = vmul.f32 %v527_v16, %v298_v18 }
  0xaf   : > { %v300_v20 = vmul.f32 0.5, %v299_v19 }
  0xb1   : > { %v301_v21 = vsub.f32 1.5, %v300_v20 }
  0xb2   : > { %v529_v22 = vpop.eup %528 }
  0xb3   : > { %v308_v23 = vmul.f32 %v529_v22, %v296_v17  ;;  %v302_v24 = vmul.f32 %v527_v16, %v301_v21  ;;  %vm314_vm3 = vweird.f32 %v529_v22 }
  0xb4   : > { %vm315_vm5 = vmor %vm313_vm4, %vm314_vm3 }
  0xb5   : > { %v309_v26 = vmul.f32 %v529_v22, %v308_v23  ;;  %v306_v27 = vsel %vm305_vm2, %v527_v16, %v302_v24 }
  0xb6   : > { %v321_v28 = vmul.f32 %v317_v25, %v306_v27 }
  0xb7   : > { %v310_v29 = vmul.f32 0.5, %v309_v26 }
  0xb8   : > { %329 = vperm.xlu2 %523, %v321_v28   ;;  %v323_v31 = vmul.f32 %v321_v28, %v279_v62 }
  0xb9   : > { %v311_v32 = vsub.f32 1.5, %v310_v29 }
  0xba   : > { %v325_v33 = vsub.f32 %v319_v30, %v323_v31 }
  0xbb   : > { %v312_v35 = vmul.f32 %v529_v22, %v311_v32 }
  0xbc   : > { %339 = vperm.xlu0 %524, %v325_v33  }
  0xbd   : > { %v316_v36 = vsel %vm315_vm5, %v529_v22, %v312_v35 }
  0xbe   : > { %v322_v37 = vmul.f32 %v318_v34, %v316_v36 }
  0xc0   : > { %334 = vperm.xlu2 %523, %v322_v37   ;;  %v324_v39 = vmul.f32 %v322_v37, %v280_v10 }
  0xc2   : > { %v326_v40 = vsub.f32 %v320_v38, %v324_v39 }
  0xc4   : > { %344 = vperm.xlu1 %525, %v326_v40  }
 0x112   : > { %v330_v41 = vpop.permute.xlu2 %329 }
 0x113   : > { %v347_v42 = vmul.f32 %v330_v41, %v673_v0  ;;  %v348_v43 = vmul.f32 %v330_v41, %v675_v1 }
 0x11a   : > { %v335_v47 = vpop.permute.xlu2 %334 }
 0x11b   : > { %v349_v48 = vmul.f32 %v335_v47, %v677_v2  ;;  %v350_v0 = vmul.f32 %v335_v47, %v685_v7 }
 0x12e   : > { %v340_v44 = vpop.permute.xlu0 %339 }
 0x12f   : > { %v351_v45 = vadd.f32 %v347_v42, %v340_v44  ;;  %v352_v46 = vadd.f32 %v348_v43, %v340_v44 }
 0x131   : > { %355 = vst [vmem:[%s193_s17] sm:$0xff] %v351_v45 }
 0x132   : > { %356 = vst [vmem:[%s193_s17 + $0x8] sm:$0xff] %v352_v46 }
 0x136   : > { %v345_v1 = vpop.permute.xlu1 %344 }
 0x137   : > { %v353_v49 = vadd.f32 %v349_v48, %v345_v1  ;;  %v354_v50 = vadd.f32 %v350_v0, %v345_v1 }
 0x139   : > { %357 = vst [vmem:[%s193_s17 + $0x10] sm:$0xff] %v353_v49 }
 0x13a   : > { %358 = vst [vmem:[%s193_s17 + $0x18] sm:$0xff] %v354_v50 }
 0x13b   : > { %557 = shalt.err (!%p554_p3)
}
 0x13c   : > { %s595_s7 = smov 256   ;;  %s596_s8 = smov 16  }
 0x13d   : > { %481 = dma.vmem_to_hbm [thread:$0]  (%p655_p5), %s373_s25, 512, %s375_s26, %s360_s16, %s595_s7, %s595_s7, %s596_s8  }
 0x13e PF: > { %p487_p4 = scmp.ge.s32.totalorder %s592_s15, 2  ;;  %s389_s9 = sand.u32 1, %s580_s12  }
 0x13f   : > { %s390_s10 = scalar_lea.sflag [#allocation3], %s389_s9 }
 0x140   : > { %p484_p7 = pnand %p487_p4, %p659_p6 }
 0x142   : > { %p485_p8 = pneg %p484_p7 }
 0x144   : > { %575 = dma.done.wait (%p485_p8), %s390_s10, 512  }
 0x145   : > { %577 = vsyncadd (%p485_p8), %s390_s10, 4294966784  ;;  %p13_p9 = scmp.ge.s32.totalorder %s642_s18, 4   ;;  %s746_s12 = smov %s584_s13 }
 0x146   : > { %s747_s13 = smov %s588_s14  ;;  %s748_s14 = smov %s653_s21 }
 0x147   : > { %s749_s15 = smov %s642_s18  ;;  %15 = sbr.rel (!%p13_p9) target bundleno = 3 (0x3), region = 73 }
 0x14c   :  { %396 = vsyncpa [#allocation3], 1 }
 0x14d   :  { %398 = vsyncpa [#allocation3 + $0x1], 1 }

</bundles_post_ra>
